<compile_context>
chip_gen: v6e
topology: v6e:2x2x1
jax: 0.10.0
libtpu: 0.0.40
codegen_flags: <defaults>
</compile_context>

<pallas_src>
import functools

import jax
import jax.numpy as jnp
from jax.experimental import pallas as pl
from jax.experimental.pallas import tpu as pltpu

_SUBLANE = 8
_MAX_BLOCK_B = 4096  # rows per grid step cap (keeps VMEM + compile time small)


def _round_up(n, m):
    return ((n + m - 1) // m) * m


def _cdiv(a, b):
    return (a + b - 1) // b


def _choose_block_b(B):
    """Sublane-aligned batch tile. >=2 (even) grid steps for B>8 (v7x megacore)."""
    if B <= _SUBLANE:
        return _round_up(B, _SUBLANE)
    steps = _cdiv(B, _MAX_BLOCK_B)
    steps = max(2, steps + (steps % 2))          # at least 2, and even
    return _round_up(_cdiv(B, steps), _SUBLANE)


def dqn_kernel(x_ref, w1_ref, b1_ref, w2_ref, b2_ref, o_ref):
    # Layer 1 on the MXU with f32 accumulation; bias add + ReLU on the VPU in f32.
    h = jnp.dot(x_ref[...], w1_ref[...], preferred_element_type=jnp.float32)
    h = jnp.maximum(h + b1_ref[...], 0.0)
    # Layer 2: cast only the GEMM operand to the weight dtype (no-op for f32).
    out = jnp.dot(h.astype(w2_ref.dtype), w2_ref[...],
                  preferred_element_type=jnp.float32) + b2_ref[...]
    o_ref[...] = out.astype(o_ref.dtype)


@functools.partial(jax.jit, static_argnames=("block_b",))
def dqn_forward(x, w1, b1, w2, b2, *, block_b=None):
    """relu(x @ w1 + b1) @ w2 + b2, computed by one fused Pallas TPU kernel.

    x:  (B, in_size)
    w1: (in_size, hidden), b1: (1, hidden) or (hidden,)
    w2: (hidden, out_size), b2: (1, out_size) or (out_size,)
    """
    B, in_size = x.shape
    hidden = w1.shape[1]
    out_size = w2.shape[1]
    out_dtype = x.dtype

    if block_b is None:
        block_b = _choose_block_b(B)
    block_b = _round_up(max(int(block_b), _SUBLANE), _SUBLANE)
    B_pad = _round_up(B, block_b)
    grid = (B_pad // block_b,)

    # Only the batch axis is (possibly) padded; features stay at logical width.
    x_p = x if B_pad == B else jnp.pad(x, ((0, B_pad - B), (0, 0)))

    b1_2d = jnp.reshape(b1, (1, hidden)).astype(jnp.float32)
    b2_2d = jnp.reshape(b2, (1, out_size)).astype(jnp.float32)

    nbytes = lambda a: a.size * a.dtype.itemsize
    cost = pl.CostEstimate(
        flops=2 * B_pad * (in_size * hidden + hidden * out_size),
        transcendentals=0,
        bytes_accessed=(nbytes(x_p) + nbytes(w1) + nbytes(b1_2d)
                        + nbytes(w2) + nbytes(b2_2d)
                        + B_pad * out_size * jnp.dtype(out_dtype).itemsize),
    )

    out = pl.pallas_call(
        dqn_kernel,
        out_shape=jax.ShapeDtypeStruct((B_pad, out_size), out_dtype),
        grid_spec=pltpu.PrefetchScalarGridSpec(
            num_scalar_prefetch=0,
            grid=grid,
            in_specs=[
                # x: batch-tiled, logical feature width (full-dim last axis).
                pl.BlockSpec((block_b, in_size), lambda i: (i, 0)),
                # Weights / biases: VMEM-resident, logical shapes (full-dim blocks).
                pl.BlockSpec((in_size, hidden), lambda i: (0, 0)),
                pl.BlockSpec((1, hidden), lambda i: (0, 0)),
                pl.BlockSpec((hidden, out_size), lambda i: (0, 0)),
                pl.BlockSpec((1, out_size), lambda i: (0, 0)),
            ],
            # Output at logical width: no padded writeback, no wrapper column slice.
            out_specs=pl.BlockSpec((block_b, out_size), lambda i: (i, 0)),
        ),
        compiler_params=pltpu.CompilerParams(
            dimension_semantics=("parallel",),
        ),
        cost_estimate=cost,
    )(x_p, w1, b1_2d, w2, b2_2d)

    return out if B_pad == B else out[:B]


def init_dqn_params(key, input_size, hidden, output_size, dtype=jnp.float32):
    # Deterministic init mimicking PyTorch's U(-1/sqrt(fan_in), 1/sqrt(fan_in)).
    k1, k2, k3, k4 = jax.random.split(key, 4)
    bound1 = 1.0 / jnp.sqrt(jnp.float32(input_size))
    bound2 = 1.0 / jnp.sqrt(jnp.float32(hidden))
    w1 = jax.random.uniform(k1, (input_size, hidden), dtype, -bound1, bound1)
    b1 = jax.random.uniform(k2, (1, hidden), dtype, -bound1, bound1)
    w2 = jax.random.uniform(k3, (hidden, output_size), dtype, -bound2, bound2)
    b2 = jax.random.uniform(k4, (1, output_size), dtype, -bound2, bound2)
    return w1, b1, w2, b2


def _reference(x, w1, b1, w2, b2):
    return jnp.maximum(x @ w1 + b1, 0.0) @ w2 + b2


if __name__ == "__main__":
    key = jax.random.PRNGKey(0)
    kx, kx2, kp = jax.random.split(key, 3)

    input_size = 16   # state dimension
    hidden = 32       # fixed by the module
    output_size = 4   # number of actions

    w1, b1, w2, b2 = init_dqn_params(kp, input_size, hidden, output_size)

    # Small-batch case (inference-like).
    batch = 8
    x = jax.random.normal(kx, (batch, input_size), dtype=jnp.float32)
    out = jax.block_until_ready(dqn_forward(x, w1, b1, w2, b2))
    ref = _reference(x, w1, b1, w2, b2)
    assert out.shape == (batch, output_size)
    assert jnp.allclose(out, ref, atol=1e-5, rtol=1e-5)

    # Mid-size batch: exercises batch padding and a >=2-step "parallel" grid
    # (both v7x TensorCores get work).
    batch2 = 300
    x2 = jax.random.normal(kx2, (batch2, input_size), dtype=jnp.float32)
    out2 = jax.block_until_ready(dqn_forward(x2, w1, b1, w2, b2))
    ref2 = _reference(x2, w1, b1, w2, b2)
    assert out2.shape == (batch2, output_size)
    assert jnp.allclose(out2, ref2, atol=1e-5, rtol=1e-5)

    print("KERNEL_OK")
</pallas_src>

<mosaic_0001>
module attributes {stable_mosaic.version = 11 : i64} {
  func.func @dqn_kernel(%arg0: i32, %arg1: memref<8x16xf32, #tpu.memory_space<vmem>>, %arg2: memref<16x32xf32, #tpu.memory_space<vmem>>, %arg3: memref<1x32xf32, #tpu.memory_space<vmem>>, %arg4: memref<32x4xf32, #tpu.memory_space<vmem>>, %arg5: memref<1x4xf32, #tpu.memory_space<vmem>>, %arg6: memref<8x4xf32, #tpu.memory_space<vmem>>) attributes {dimension_semantics = [#tpu.dimension_semantics<parallel>], iteration_bounds = array<i64: 1>, scalar_prefetch = 0 : i64, scratch_operands = 0 : i64, tpu.core_type = #tpu.core_type<tc>, window_params = [{transform_indices = @transform_0, window_bounds = array<i64: 8, 16>}, {pipeline_mode = #tpu.pipeline_mode<synchronous>, transform_indices = @transform_1, window_bounds = array<i64: 16, 32>}, {pipeline_mode = #tpu.pipeline_mode<synchronous>, transform_indices = @transform_2, window_bounds = array<i64: 1, 32>}, {pipeline_mode = #tpu.pipeline_mode<synchronous>, transform_indices = @transform_3, window_bounds = array<i64: 32, 4>}, {pipeline_mode = #tpu.pipeline_mode<synchronous>, transform_indices = @transform_4, window_bounds = array<i64: 1, 4>}, {transform_indices = @transform_5, window_bounds = array<i64: 8, 4>}]} {
    %c0 = arith.constant 0 : index
    %c0_0 = arith.constant 0 : index
    %0 = vector.load %arg1[%c0, %c0_0] : memref<8x16xf32, #tpu.memory_space<vmem>>, vector<8x16xf32>
    %c0_1 = arith.constant 0 : index
    %c0_2 = arith.constant 0 : index
    %1 = vector.load %arg2[%c0_1, %c0_2] : memref<16x32xf32, #tpu.memory_space<vmem>>, vector<16x32xf32>
    %cst = arith.constant dense<0.000000e+00> : vector<8x32xf32>
    %2 = tpu.matmul %0, %1, %cst {dimension_numbers = #tpu.dot_dimension_numbers<[1], [0], [0], [1], [0, 0, 1, 1], [], []>} : vector<8x16xf32>, vector<16x32xf32>, vector<8x32xf32> -> vector<8x32xf32>
    %c0_3 = arith.constant 0 : index
    %c0_4 = arith.constant 0 : index
    %3 = vector.load %arg3[%c0_3, %c0_4] : memref<1x32xf32, #tpu.memory_space<vmem>>, vector<1x32xf32>
    %4 = vector.broadcast %3 : vector<1x32xf32> to vector<8x32xf32>
    %5 = arith.addf %2, %4 : vector<8x32xf32>
    %cst_5 = arith.constant 0.000000e+00 : f32
    %6 = vector.broadcast %cst_5 : f32 to vector<8x32xf32>
    %7 = arith.maximumf %5, %6 : vector<8x32xf32>
    %c0_6 = arith.constant 0 : index
    %c0_7 = arith.constant 0 : index
    %8 = vector.load %arg4[%c0_6, %c0_7] : memref<32x4xf32, #tpu.memory_space<vmem>>, vector<32x4xf32>
    %cst_8 = arith.constant dense<0.000000e+00> : vector<8x4xf32>
    %9 = tpu.matmul %7, %8, %cst_8 {dimension_numbers = #tpu.dot_dimension_numbers<[1], [0], [0], [1], [0, 0, 1, 1], [], []>} : vector<8x32xf32>, vector<32x4xf32>, vector<8x4xf32> -> vector<8x4xf32>
    %c0_9 = arith.constant 0 : index
    %c0_10 = arith.constant 0 : index
    %10 = vector.load %arg5[%c0_9, %c0_10] : memref<1x4xf32, #tpu.memory_space<vmem>>, vector<1x4xf32>
    %11 = vector.broadcast %10 : vector<1x4xf32> to vector<8x4xf32>
    %12 = arith.addf %9, %11 : vector<8x4xf32>
    %c0_11 = arith.constant 0 : index
    %c0_12 = arith.constant 0 : index
    %13 = vector.load %arg6[%c0_11, %c0_12] : memref<8x4xf32, #tpu.memory_space<vmem>>, vector<8x4xf32>
    tpu.vector_store %arg6[%c0_11, %c0_12], %12 {strides = array<i32>} : memref<8x4xf32, #tpu.memory_space<vmem>>, vector<8x4xf32>,
    return
  }
  func.func @transform_0(%arg0: i32) -> (i32, i32) {
    %c0_i32 = arith.constant 0 : i32
    %c0_i32_0 = arith.constant 0 : i32
    return %arg0, %c0_i32 : i32, i32
  }
  func.func @transform_1(%arg0: i32) -> (i32, i32) {
    %c0_i32 = arith.constant 0 : i32
    %c0_i32_0 = arith.constant 0 : i32
    %c0_i32_1 = arith.constant 0 : i32
    return %c0_i32, %c0_i32_0 : i32, i32
  }
  func.func @transform_2(%arg0: i32) -> (i32, i32) {
    %c0_i32 = arith.constant 0 : i32
    %c0_i32_0 = arith.constant 0 : i32
    %c0_i32_1 = arith.constant 0 : i32
    return %c0_i32, %c0_i32_0 : i32, i32
  }
  func.func @transform_3(%arg0: i32) -> (i32, i32) {
    %c0_i32 = arith.constant 0 : i32
    %c0_i32_0 = arith.constant 0 : i32
    %c0_i32_1 = arith.constant 0 : i32
    return %c0_i32, %c0_i32_0 : i32, i32
  }
  func.func @transform_4(%arg0: i32) -> (i32, i32) {
    %c0_i32 = arith.constant 0 : i32
    %c0_i32_0 = arith.constant 0 : i32
    %c0_i32_1 = arith.constant 0 : i32
    return %c0_i32, %c0_i32_0 : i32, i32
  }
  func.func @transform_5(%arg0: i32) -> (i32, i32) {
    %c0_i32 = arith.constant 0 : i32
    %c0_i32_0 = arith.constant 0 : i32
    return %arg0, %c0_i32 : i32, i32
  }
}

</mosaic_0001>

<bundles_post_ra>
// kernel: dqn_forward.1
= control target key start
LH: loop header
LB: loop body
LE: loop exit
PB: predicated region body
PF: predicated region fallthrough
CT: control target
= control target key end

     0   :  { %v228_v0 = vmov 0.0   ;;  %vm229_vm0 = vmmov 0   ;;  %vm30_vm1 = vcmask 130048   ;;  %vm116_vm2 = vcmask 261120   ;;  %s290_s1 = inlined_call_operand.vmem [shape: f32[16,32], index: 1, kind: input, shape index: {}]   ;;  %s291_s0 = inlined_call_operand.vmem [shape: f32[8,16], index: 0, kind: input, shape index: {}]   ;;  %s292_s3 = inlined_call_operand.vmem [shape: f32[32,4], index: 3, kind: input, shape index: {}]   ;;  %s293_s2 = inlined_call_operand.vmem [shape: f32[1,32], index: 2, kind: input, shape index: {}]   ;;  %s294_s4 = inlined_call_operand.vmem [shape: f32[1,4], index: 4, kind: input, shape index: {}]   ;;  %s295_s5 = inlined_call_operand.vmem [shape: f32[8,4], index: 5, kind: output, shape index: {}]  }
   0x1   :  { %208 = vmatprep.subr.mxu0 %v228_v0  ;;  %v22_v1 = vld [vmem:[%s290_s1 + $0x8] sm:$0xff]  ;;  %v21_v2 = vld [vmem:[%s290_s1] sm:$0xff]  ;;  %212 = vmatprep.mubr.msk.f32.mxu0 %vm229_vm0, %v228_v0  ;;  %v108_v4 = vld [vmem:[%s292_s3 + $0x18] sm:$0xff]  ;;  %vm190_vm3 = vcmask 31744  }
   0x2   :  { %209 = vmatpush3.msra.mxu0 %v22_v1  ;;  %v20_v3 = vld [vmem:[%s291_s0] sm:$0xff]  ;;  %215 = vmatprep.subr.mxu1 %v228_v0  ;;  %v107_v5 = vld [vmem:[%s292_s3 + $0x10] sm:$0xff]  ;;  %v106_v6 = vld [vmem:[%s292_s3 + $0x8] sm:$0xff] }
   0x3   :  { %210 = vmatprep.subr.mxu0 %v228_v0  ;;  %216 = vmatpush3.msra.mxu1 %v108_v4  ;;  %v105_v7 = vld [vmem:[%s292_s3] sm:$0xff] }
   0x4   :  { %211 = vmatpush3.msra.mxu0 %v21_v2  ;;  %217 = vmatprep.subr.mxu1 %v228_v0  ;;  %v196_v8 = vld [vmem:[%s293_s2] ss:$0 sm:$0xff] }
   0x5   :  { %213 = vmatmul.mubr.msk.f32.vlgmr.msra.gmra.mxu0 %vm30_vm1, %v20_v3  ;;  %223 = vmatprep.mubr.msk.f32.mxu1 %vm229_vm0, %v228_v0  ;;  %v198_v13 = vld [vmem:[%s294_s4] ss:$0 sm:$0xff] }
   0x6   :  { %218 = vmatpush3.msra.mxu1 %v107_v5 }
   0x7   :  { %219 = vmatprep.subr.mxu1 %v228_v0 }
   0x8   :  { %220 = vmatpush3.msra.mxu1 %v106_v6 }
   0x9   :  { %221 = vmatprep.subr.mxu1 %v228_v0 }
   0xa   :  { %222 = vmatpush3.msra.mxu1 %v105_v7 }
  0xc5   :  { %v100_v9 = vpop.f32.mrf.mxu0 }
  0xc6   :  { %v101_v10 = vadd.f32 %v196_v8, %v100_v9 }
  0xc7   :  { %v214_v11 = vpop.f32.mrf.mxu0 }
  0xc8   :  { %v104_v12 = vmax.f32 %v101_v10, 0.0 }
  0xca   :  { %224 = vmatmul.mubr.msk.f32.vlgmr.msra.gmra.mxu1 %vm116_vm2, %v104_v12 }
 0x18a   :  { %v186_v14 = vpop.f32.mrf.mxu1 }
 0x18b   :  { %v187_v15 = vadd.f32 %v198_v13, %v186_v14 }
 0x18c   :  { %v225_v16 = vpop.f32.mrf.mxu1 }
 0x18d   :  { %191 = vst.msk [vmem:[%s295_s5] sm:$0xff] %vm190_vm3, %v187_v15 }

</bundles_post_ra>
